<compile_context>
chip_gen: v5e
topology: v5e:2x2
jax: 0.10.0
libtpu: 0.0.40
codegen_flags: <defaults>
</compile_context>

<pallas_src>
import functools

import jax
import jax.numpy as jnp
from jax.experimental import pallas as pl
from jax.experimental.pallas import tpu as pltpu

LAMBDA_GLOBAL = 0.5  # const.LAMBDA_GLOBAL (not provided) -> fixed to 0.5


def _round_up(n, m):
    return ((n + m - 1) // m) * m


def _pad2d(x, rows, cols):
    r, c = x.shape
    if r == rows and c == cols:
        return x
    return jnp.pad(x, ((0, rows - r), (0, cols - c)))


def _sigmoid(x):
    # Numerically stable; tanh runs in the (otherwise idle) EUP slot.
    return 0.5 * (jnp.tanh(0.5 * x) + 1.0)


def drugncf_kernel(du_ref, w1_ref, b1_ref, w2_ref, b2_ref,
                   mg_ref, rhs_ref, bias_ref, out_ref, wh_ref, *, f_p):
    """One (TD, TA) output tile of the fused DrugNCFwoshare forward.

    Grid = (drug-row tiles ["parallel"], ADR-column tiles ["arbitrary"]).
    All scale factors (lam, (1-lam)*g2_w, (1-lam)*g2_b) were pre-folded into
    mg/rhs/bias in the wrapper, so the epilogue is a single sigmoid.
    """
    j = pl.program_id(1)

    # --- j-invariant MLP: computed once per row tile, cached in VMEM scratch ---
    @pl.when(j == 0)
    def _():
        drug = du_ref[:, :f_p]                                              # (TD, Fp)
        h = jnp.dot(drug, w1_ref[...], preferred_element_type=jnp.float32) + b1_ref[...]
        h = jnp.maximum(h, 0.0).astype(w2_ref.dtype)                        # (TD, Hp)
        wh = _sigmoid(jnp.dot(h, w2_ref[...], preferred_element_type=jnp.float32)
                      + b2_ref[...])                                        # (TD, Kp)
        # NOTE: padded columns K..Kp of wh are sigmoid(0)=0.5, NOT 0.  This is
        # harmless ONLY because mg_ref's padded rows are exactly zero.  Keep it
        # that way if the padding/folding order is ever changed.
        wh_ref[...] = wh.astype(wh_ref.dtype)

    # --- per-column-tile work: two MXU dots + bias + sigmoid ---
    acc = jnp.dot(wh_ref[...], mg_ref[...], preferred_element_type=jnp.float32)
    acc = acc + jnp.dot(du_ref[...], rhs_ref[...], preferred_element_type=jnp.float32)
    acc = acc + bias_ref[...]
    out_ref[...] = _sigmoid(acc).astype(out_ref.dtype)


def drugncf_forward(drug_features, U_emb, V_emb, V1_emb, params,
                    *, compute_dtype=jnp.bfloat16, out_dtype=jnp.float32,
                    tile_d=512, tile_a=1024, lam=LAMBDA_GLOBAL):
    """Fused forward.  Returns sigmoid(out).reshape(-1) as f32."""
    nDrug, F = drug_features.shape
    nADR, K = V_emb.shape
    H = params["w1"].shape[1]

    lam = float(lam)
    g2_w = float(params["g2_w"])
    g2_b = float(params["g2_b"])
    c1 = (1.0 - lam) * g2_w
    c0 = (1.0 - lam) * g2_b

    # ---- algebraic folding (tiny, once per call, outside the hot kernel) ----
    # linear_g(t @ V^T) = t @ (V^T @ Wg^T) + g_b  ->  M_g has shape (K, A).
    # The lam / (1-lam)*g2_w / (1-lam)*g2_b scalars are folded into the weights
    # and the combined bias so the kernel epilogue is a single sigmoid.
    Mg = lam * jnp.dot(V_emb.T, params["g_wT"],
                       preferred_element_type=jnp.float32)          # (K, A)
    lrw = lam * params["lr_wT"]                                      # (F, A)
    v1t = c1 * V1_emb.T                                              # (K, A)
    bias = lam * (params["g_b"] + params["lr_b"]) + c0               # (1, A)

    cd = jnp.dtype(compute_dtype)
    sub = 16 if cd.itemsize == 2 else 8  # sublane packing for the row dimension

    # ---- lane-dense padding (multiples of 128 on lanes, sublane pack on rows) ----
    F_p = _round_up(F, 128)
    H_p = _round_up(H, 128)
    K_p = _round_up(K, 128)
    A_128 = _round_up(nADR, 128)
    TA = max(128, (min(tile_a, A_128) // 128) * 128)
    A_p = _round_up(A_128, TA)
    D_r = _round_up(nDrug, sub)
    TD = max(sub, (min(tile_d, D_r) // sub) * sub)
    D_p = _round_up(D_r, TD)
    FK_p = F_p + K_p

    # Row operands: drug features and U_emb fused along the contraction axis so
    # (drug @ lam*lr_wT) and (U @ c1*V1^T) become one deeper MXU contraction.
    drug_p = _pad2d(drug_features, D_p, F_p)
    u_p = _pad2d(U_emb, D_p, K_p)
    du_p = jnp.concatenate([drug_p, u_p], axis=1).astype(cd)          # (D_p, FK_p)
    rhs_p = jnp.concatenate([_pad2d(lrw, F_p, A_p),
                             _pad2d(v1t, K_p, A_p)], axis=0).astype(cd)  # (FK_p, A_p)

    w1_p = _pad2d(params["w1"], F_p, H_p).astype(cd)
    b1_p = _pad2d(params["b1"], 1, H_p).astype(jnp.float32)
    w2_p = _pad2d(params["w2"], H_p, K_p).astype(cd)
    b2_p = _pad2d(params["b2"], 1, K_p).astype(jnp.float32)
    mg_p = _pad2d(Mg, K_p, A_p).astype(cd)
    bias_p = _pad2d(bias, 1, A_p).astype(jnp.float32)

    kernel = functools.partial(drugncf_kernel, f_p=F_p)

    grid = (D_p // TD, A_p // TA)
    row_spec = lambda shape: pl.BlockSpec(shape, lambda i, j: (i, 0))  # drug-row tiles
    col_spec = lambda shape: pl.BlockSpec(shape, lambda i, j: (0, j))  # ADR-col tiles
    fix_spec = lambda shape: pl.BlockSpec(shape, lambda i, j: (0, 0))  # resident weights

    # Rough VMEM footprint (double-buffered inputs + output + scratch), used to
    # set an explicit scoped-VMEM limit (v5e default is only 16 MiB); capped at
    # 64 MiB so the same config is safe on v7x's smaller physical VMEM.
    cb, ob = cd.itemsize, jnp.dtype(out_dtype).itemsize
    est = (2 * TD * FK_p * cb                      # [drug | U] row tile
           + 2 * (F_p * H_p + H_p * K_p) * cb      # MLP weights (resident)
           + 2 * (H_p + K_p) * 4                   # MLP biases
           + 2 * (K_p * TA + FK_p * TA) * cb       # Mg + stacked RHS column tiles
           + 2 * TA * 4                            # bias column tile
           + 2 * TD * TA * ob                      # output tile
           + TD * K_p * cb)                        # wh scratch
    vmem_limit = int(min(max(2 * est, 32 * 1024 * 1024), 64 * 1024 * 1024))

    out = pl.pallas_call(
        kernel,
        out_shape=jax.ShapeDtypeStruct((D_p, A_p), out_dtype),
        grid=grid,
        in_specs=[
            row_spec((TD, FK_p)),       # [drug | U_emb] row tile
            fix_spec((F_p, H_p)),       # w1                      (resident)
            fix_spec((1, H_p)),         # b1                      (resident)
            fix_spec((H_p, K_p)),       # w2                      (resident)
            fix_spec((1, K_p)),         # b2                      (resident)
            col_spec((K_p, TA)),        # lam * (V^T Wg^T)        column tile
            col_spec((FK_p, TA)),       # [lam*lr_wT ; c1*V1^T]   column tile
            col_spec((1, TA)),          # lam*(g_b+lr_b) + c0     column tile
        ],
        out_specs=pl.BlockSpec((TD, TA), lambda i, j: (i, j)),
        scratch_shapes=[pltpu.VMEM((TD, K_p), cd)],
        compiler_params=pltpu.CompilerParams(
            # Axis 1 must be sequential ("arbitrary") so the wh scratch computed
            # at j == 0 persists across the column tiles of the same row tile.
            dimension_semantics=("parallel", "arbitrary"),
            vmem_limit_bytes=vmem_limit),
    )(du_p, w1_p, b1_p, w2_p, b2_p, mg_p, rhs_p, bias_p)

    return out[:nDrug, :nADR].astype(jnp.float32).reshape(-1)


def reference_forward(drug_features, U_emb, V_emb, V1_emb, params,
                      lam=LAMBDA_GLOBAL):
    """Pure-JAX reference in the original PyTorch op order."""
    h = jnp.maximum(drug_features @ params["w1"] + params["b1"], 0.0)
    wide_hidden = jax.nn.sigmoid(h @ params["w2"] + params["b2"])
    wide = wide_hidden @ V_emb.T
    wide = wide @ params["g_wT"] + params["g_b"]
    wide_lr = drug_features @ params["lr_wT"] + params["lr_b"]
    wide = wide_lr + wide
    mf = U_emb @ V1_emb.T
    mf = params["g2_w"] * mf + params["g2_b"]
    out = lam * wide + (1.0 - lam) * mf
    return jax.nn.sigmoid(out).reshape(-1)


if __name__ == "__main__":
    # Small, forward-consistent shapes
    field_dims = (32, 32)
    F = sum(field_dims)          # 64
    K = 32                       # embed_dim
    H = 48                       # mlp_dims_wide = (48,)
    num_users = nDrug = 8
    num_items = nADR = 16

    key = jax.random.PRNGKey(0)
    ks = jax.random.split(key, 12)

    # Embedding tables (num_users+1, K), (num_items+1, K)
    W_table = jax.random.normal(ks[0], (num_users + 1, K), jnp.float32) * 0.1
    H_table = jax.random.normal(ks[1], (num_items + 1, K), jnp.float32) * 0.1
    H1_table = jax.random.normal(ks[2], (num_items + 1, K), jnp.float32) * 0.1

    params = {
        # mlp_wide: Linear(F,H) -> ReLU -> Linear(H,K) -> Sigmoid
        "w1": jax.random.normal(ks[3], (F, H), jnp.float32) * 0.1,
        "b1": jax.random.normal(ks[4], (1, H), jnp.float32) * 0.1,
        "w2": jax.random.normal(ks[5], (H, K), jnp.float32) * 0.1,
        "b2": jax.random.normal(ks[6], (1, K), jnp.float32) * 0.1,
        # linear_g: nn.Linear(num_items, num_items) -> store W.T
        "g_wT": jax.random.normal(ks[7], (nADR, nADR), jnp.float32) * 0.1,
        "g_b": jax.random.normal(ks[8], (1, nADR), jnp.float32) * 0.1,
        # lr: FeaturesLinear ~ Linear(F, num_items) -> store W.T
        "lr_wT": jax.random.normal(ks[9], (F, nADR), jnp.float32) * 0.1,
        "lr_b": jax.random.normal(ks[10], (1, nADR), jnp.float32) * 0.1,
        # linear_g2: nn.Linear(1, 1) -> elementwise scalar affine
        "g2_w": 0.7,
        "g2_b": -0.3,
    }

    # Inputs: x = drug indices, adr_idx = ADR indices, drug_features_x = fingerprints
    x = jnp.arange(nDrug, dtype=jnp.int32)
    adr_idx = jnp.arange(nADR, dtype=jnp.int32)
    drug_features_x = (jax.random.uniform(ks[11], (nDrug, F)) > 0.5).astype(jnp.float32)

    # Embedding lookups (glue; gather outside the kernel)
    U_emb = W_table[x]            # (nDrug, K)
    V_emb = H_table[adr_idx]      # (nADR, K)
    V1_emb = H1_table[adr_idx]    # (nADR, K)

    ref = reference_forward(drug_features_x, U_emb, V_emb, V1_emb, params)

    # f32 path: faithful to the reference up to safe re-association of the folds
    out_f32 = drugncf_forward(drug_features_x, U_emb, V_emb, V1_emb, params,
                              compute_dtype=jnp.float32)
    out_f32 = jax.block_until_ready(out_f32)
    assert out_f32.shape == (nDrug * nADR,)
    assert jnp.allclose(out_f32, ref, rtol=1e-5, atol=2e-5), "f32 mismatch vs reference"

    # Default bf16 streaming / f32 accumulation path: looser tolerance
    out_bf16 = drugncf_forward(drug_features_x, U_emb, V_emb, V1_emb, params)
    out_bf16 = jax.block_until_ready(out_bf16)
    assert out_bf16.shape == (nDrug * nADR,)
    assert jnp.allclose(out_bf16, ref, atol=5e-2), "bf16 mismatch vs reference"

    print("KERNEL_OK")
</pallas_src>

<mosaic_0001>
module attributes {stable_mosaic.version = 11 : i64} {
  func.func @drugncf_kernel(%arg0: i32, %arg1: i32, %arg2: memref<8x256xf32, #tpu.memory_space<vmem>>, %arg3: memref<128x128xf32, #tpu.memory_space<vmem>>, %arg4: memref<1x128xf32, #tpu.memory_space<vmem>>, %arg5: memref<128x128xf32, #tpu.memory_space<vmem>>, %arg6: memref<1x128xf32, #tpu.memory_space<vmem>>, %arg7: memref<128x128xf32, #tpu.memory_space<vmem>>, %arg8: memref<256x128xf32, #tpu.memory_space<vmem>>, %arg9: memref<1x128xf32, #tpu.memory_space<vmem>>, %arg10: memref<8x128xf32, #tpu.memory_space<vmem>>, %arg11: memref<8x128xf32, #tpu.memory_space<vmem>>) attributes {dimension_semantics = [#tpu.dimension_semantics<parallel>, #tpu.dimension_semantics<arbitrary>], iteration_bounds = array<i64: 1, 1>, scalar_prefetch = 0 : i64, scratch_operands = 1 : i64, tpu.core_type = #tpu.core_type<tc>, window_params = [{transform_indices = @transform_0, window_bounds = array<i64: 8, 256>}, {pipeline_mode = #tpu.pipeline_mode<synchronous>, transform_indices = @transform_1, window_bounds = array<i64: 128, 128>}, {pipeline_mode = #tpu.pipeline_mode<synchronous>, transform_indices = @transform_2, window_bounds = array<i64: 1, 128>}, {pipeline_mode = #tpu.pipeline_mode<synchronous>, transform_indices = @transform_3, window_bounds = array<i64: 128, 128>}, {pipeline_mode = #tpu.pipeline_mode<synchronous>, transform_indices = @transform_4, window_bounds = array<i64: 1, 128>}, {transform_indices = @transform_5, window_bounds = array<i64: 128, 128>}, {transform_indices = @transform_6, window_bounds = array<i64: 256, 128>}, {transform_indices = @transform_7, window_bounds = array<i64: 1, 128>}, {transform_indices = @transform_8, window_bounds = array<i64: 8, 128>}]} {
    %c0_i32 = arith.constant 0 : i32
    %0 = arith.cmpi eq, %arg1, %c0_i32 : i32
    %1 = arith.extui %0 : i1 to i32
    %c0_i32_0 = arith.constant 0 : i32
    %2 = arith.cmpi ne, %1, %c0_i32_0 : i32
    scf.if %2 {
      %c0_16 = arith.constant 0 : index
      %c0_17 = arith.constant 0 : index
      %21 = vector.load %arg2[%c0_16, %c0_17] : memref<8x256xf32, #tpu.memory_space<vmem>>, vector<8x128xf32>
      %c0_18 = arith.constant 0 : index
      %c0_19 = arith.constant 0 : index
      %22 = vector.load %arg3[%c0_18, %c0_19] : memref<128x128xf32, #tpu.memory_space<vmem>>, vector<128x128xf32>
      %cst_20 = arith.constant dense<0.000000e+00> : vector<8x128xf32>
      %23 = tpu.matmul %21, %22, %cst_20 {dimension_numbers = #tpu.dot_dimension_numbers<[1], [0], [0], [1], [0, 0, 1, 1], [], []>} : vector<8x128xf32>, vector<128x128xf32>, vector<8x128xf32> -> vector<8x128xf32>
      %c0_21 = arith.constant 0 : index
      %c0_22 = arith.constant 0 : index
      %24 = vector.load %arg4[%c0_21, %c0_22] : memref<1x128xf32, #tpu.memory_space<vmem>>, vector<1x128xf32>
      %25 = vector.broadcast %24 : vector<1x128xf32> to vector<8x128xf32>
      %26 = arith.addf %23, %25 : vector<8x128xf32>
      %cst_23 = arith.constant 0.000000e+00 : f32
      %27 = vector.broadcast %cst_23 : f32 to vector<8x128xf32>
      %28 = arith.maximumf %26, %27 : vector<8x128xf32>
      %c0_24 = arith.constant 0 : index
      %c0_25 = arith.constant 0 : index
      %29 = vector.load %arg5[%c0_24, %c0_25] : memref<128x128xf32, #tpu.memory_space<vmem>>, vector<128x128xf32>
      %cst_26 = arith.constant dense<0.000000e+00> : vector<8x128xf32>
      %30 = tpu.matmul %28, %29, %cst_26 {dimension_numbers = #tpu.dot_dimension_numbers<[1], [0], [0], [1], [0, 0, 1, 1], [], []>} : vector<8x128xf32>, vector<128x128xf32>, vector<8x128xf32> -> vector<8x128xf32>
      %c0_27 = arith.constant 0 : index
      %c0_28 = arith.constant 0 : index
      %31 = vector.load %arg6[%c0_27, %c0_28] : memref<1x128xf32, #tpu.memory_space<vmem>>, vector<1x128xf32>
      %32 = vector.broadcast %31 : vector<1x128xf32> to vector<8x128xf32>
      %33 = arith.addf %30, %32 : vector<8x128xf32>
      %cst_29 = arith.constant 5.000000e-01 : f32
      %34 = vector.broadcast %cst_29 : f32 to vector<8x128xf32>
      %35 = arith.mulf %34, %33 : vector<8x128xf32>
      %36 = math.tanh %35 : vector<8x128xf32>
      %cst_30 = arith.constant 1.000000e+00 : f32
      %37 = vector.broadcast %cst_30 : f32 to vector<8x128xf32>
      %38 = arith.addf %36, %37 : vector<8x128xf32>
      %cst_31 = arith.constant 5.000000e-01 : f32
      %39 = vector.broadcast %cst_31 : f32 to vector<8x128xf32>
      %40 = arith.mulf %39, %38 : vector<8x128xf32>
      %c0_32 = arith.constant 0 : index
      %c0_33 = arith.constant 0 : index
      %41 = vector.load %arg11[%c0_32, %c0_33] : memref<8x128xf32, #tpu.memory_space<vmem>>, vector<8x128xf32>
      tpu.vector_store %arg11[%c0_32, %c0_33], %40 {strides = array<i32>} : memref<8x128xf32, #tpu.memory_space<vmem>>, vector<8x128xf32>,
    } else {
    }
    %c0 = arith.constant 0 : index
    %c0_1 = arith.constant 0 : index
    %3 = vector.load %arg11[%c0, %c0_1] : memref<8x128xf32, #tpu.memory_space<vmem>>, vector<8x128xf32>
    %c0_2 = arith.constant 0 : index
    %c0_3 = arith.constant 0 : index
    %4 = vector.load %arg7[%c0_2, %c0_3] : memref<128x128xf32, #tpu.memory_space<vmem>>, vector<128x128xf32>
    %cst = arith.constant dense<0.000000e+00> : vector<8x128xf32>
    %5 = tpu.matmul %3, %4, %cst {dimension_numbers = #tpu.dot_dimension_numbers<[1], [0], [0], [1], [0, 0, 1, 1], [], []>} : vector<8x128xf32>, vector<128x128xf32>, vector<8x128xf32> -> vector<8x128xf32>
    %c0_4 = arith.constant 0 : index
    %c0_5 = arith.constant 0 : index
    %6 = vector.load %arg2[%c0_4, %c0_5] : memref<8x256xf32, #tpu.memory_space<vmem>>, vector<8x256xf32>
    %c0_6 = arith.constant 0 : index
    %c0_7 = arith.constant 0 : index
    %7 = vector.load %arg8[%c0_6, %c0_7] : memref<256x128xf32, #tpu.memory_space<vmem>>, vector<256x128xf32>
    %cst_8 = arith.constant dense<0.000000e+00> : vector<8x128xf32>
    %8 = tpu.matmul %6, %7, %cst_8 {dimension_numbers = #tpu.dot_dimension_numbers<[1], [0], [0], [1], [0, 0, 1, 1], [], []>} : vector<8x256xf32>, vector<256x128xf32>, vector<8x128xf32> -> vector<8x128xf32>
    %9 = arith.addf %5, %8 : vector<8x128xf32>
    %c0_9 = arith.constant 0 : index
    %c0_10 = arith.constant 0 : index
    %10 = vector.load %arg9[%c0_9, %c0_10] : memref<1x128xf32, #tpu.memory_space<vmem>>, vector<1x128xf32>
    %11 = vector.broadcast %10 : vector<1x128xf32> to vector<8x128xf32>
    %12 = arith.addf %9, %11 : vector<8x128xf32>
    %cst_11 = arith.constant 5.000000e-01 : f32
    %13 = vector.broadcast %cst_11 : f32 to vector<8x128xf32>
    %14 = arith.mulf %13, %12 : vector<8x128xf32>
    %15 = math.tanh %14 : vector<8x128xf32>
    %cst_12 = arith.constant 1.000000e+00 : f32
    %16 = vector.broadcast %cst_12 : f32 to vector<8x128xf32>
    %17 = arith.addf %15, %16 : vector<8x128xf32>
    %cst_13 = arith.constant 5.000000e-01 : f32
    %18 = vector.broadcast %cst_13 : f32 to vector<8x128xf32>
    %19 = arith.mulf %18, %17 : vector<8x128xf32>
    %c0_14 = arith.constant 0 : index
    %c0_15 = arith.constant 0 : index
    %20 = vector.load %arg10[%c0_14, %c0_15] : memref<8x128xf32, #tpu.memory_space<vmem>>, vector<8x128xf32>
    tpu.vector_store %arg10[%c0_14, %c0_15], %19 {strides = array<i32>} : memref<8x128xf32, #tpu.memory_space<vmem>>, vector<8x128xf32>,
    return
  }
  func.func @transform_0(%arg0: i32, %arg1: i32) -> (i32, i32) {
    %c0_i32 = arith.constant 0 : i32
    %c0_i32_0 = arith.constant 0 : i32
    return %arg0, %c0_i32 : i32, i32
  }
  func.func @transform_1(%arg0: i32, %arg1: i32) -> (i32, i32) {
    %c0_i32 = arith.constant 0 : i32
    %c0_i32_0 = arith.constant 0 : i32
    %c0_i32_1 = arith.constant 0 : i32
    return %c0_i32, %c0_i32_0 : i32, i32
  }
  func.func @transform_2(%arg0: i32, %arg1: i32) -> (i32, i32) {
    %c0_i32 = arith.constant 0 : i32
    %c0_i32_0 = arith.constant 0 : i32
    %c0_i32_1 = arith.constant 0 : i32
    return %c0_i32, %c0_i32_0 : i32, i32
  }
  func.func @transform_3(%arg0: i32, %arg1: i32) -> (i32, i32) {
    %c0_i32 = arith.constant 0 : i32
    %c0_i32_0 = arith.constant 0 : i32
    %c0_i32_1 = arith.constant 0 : i32
    return %c0_i32, %c0_i32_0 : i32, i32
  }
  func.func @transform_4(%arg0: i32, %arg1: i32) -> (i32, i32) {
    %c0_i32 = arith.constant 0 : i32
    %c0_i32_0 = arith.constant 0 : i32
    %c0_i32_1 = arith.constant 0 : i32
    return %c0_i32, %c0_i32_0 : i32, i32
  }
  func.func @transform_5(%arg0: i32, %arg1: i32) -> (i32, i32) {
    %c0_i32 = arith.constant 0 : i32
    %c0_i32_0 = arith.constant 0 : i32
    return %c0_i32, %arg1 : i32, i32
  }
  func.func @transform_6(%arg0: i32, %arg1: i32) -> (i32, i32) {
    %c0_i32 = arith.constant 0 : i32
    %c0_i32_0 = arith.constant 0 : i32
    return %c0_i32, %arg1 : i32, i32
  }
  func.func @transform_7(%arg0: i32, %arg1: i32) -> (i32, i32) {
    %c0_i32 = arith.constant 0 : i32
    %c0_i32_0 = arith.constant 0 : i32
    return %c0_i32, %arg1 : i32, i32
  }
  func.func @transform_8(%arg0: i32, %arg1: i32) -> (i32, i32) {
    %c0_i32 = arith.constant 0 : i32
    return %arg0, %arg1 : i32, i32
  }
}

</mosaic_0001>

<bundles_post_ra>
// kernel: tpu_custom_call.1
= control target key start
LH: loop header
LB: loop body
LE: loop exit
PB: predicated region body
PF: predicated region fallthrough
CT: control target
= control target key end

     0   :  { %13 = vsyncpa [#allocation4], 0  ;;  %s588_s0 = inlined_call_operand.hbm [shape: f32[8,256], index: 0, kind: input, shape index: {}]   ;;  %s589_s1 = inlined_call_operand.hbm [shape: f32[128,128], index: 1, kind: input, shape index: {}]   ;;  %s590_s2 = inlined_call_operand.vmem [shape: f32[1,128], index: 2, kind: input, shape index: {}]   ;;  %s591_s3 = inlined_call_operand.hbm [shape: f32[128,128], index: 3, kind: input, shape index: {}]   ;;  %s592_s4 = inlined_call_operand.vmem [shape: f32[1,128], index: 4, kind: input, shape index: {}]   ;;  %s593_s5 = inlined_call_operand.hbm [shape: f32[128,128], index: 5, kind: input, shape index: {}]   ;;  %s594_s6 = inlined_call_operand.hbm [shape: f32[256,128], index: 6, kind: input, shape index: {}]   ;;  %s595_s7 = inlined_call_operand.vmem [shape: f32[1,128], index: 7, kind: input, shape index: {}]   ;;  %s596_s8 = inlined_call_operand.hbm [shape: f32[8,128], index: 8, kind: output, shape index: {}]  }
   0x1   :  { %14 = vsyncpa [#allocation7], 0 }
   0x2   :  { %15 = vsyncpa [#allocation10], 0  ;;  %s32_s29 = sshll.u32 %s589_s1, 4  ;;  %s33_s29 = int_to_ptr.hbm [resolvable:$true] %s32_s29 }
   0x3   :  { %16 = vsyncpa [#allocation5], 0  ;;  %s504_s30 = smov [#allocation6]   ;;  %s62_s12 = sshll.u32 %s593_s5, 4  ;;  %s63_s12 = int_to_ptr.hbm [resolvable:$true] %s62_s12 }
   0x4   :  { %s34_s9 = sshll.u32 %s504_s30, 4  ;;  %s505_s13 = smov 128   ;;  %s35_s9 = int_to_ptr.vmem [resolvable:$true] %s34_s9 }
   0x5   :  { %s506_s14 = smov 8   ;;  %s507_s15 = smov [#allocation9]  }
   0x6   :  { %40 = dma.hbm_to_vmem [thread:$0]  %s33_s29, 2048, %s35_s9, [#allocation7], %s505_s13, %s505_s13, %s506_s14  }
   0x7   :  { %s64_s16 = sshll.u32 %s507_s15, 4  ;;  %s22_s19 = sshll.u32 %s588_s0, 4  ;;  %s65_s16 = int_to_ptr.vmem [resolvable:$true] %s64_s16  ;;  %s23_s19 = int_to_ptr.hbm [resolvable:$true] %s22_s19 }
   0x8   :  { %70 = dma.hbm_to_vmem [thread:$0]  %s63_s12, 2048, %s65_s16, [#allocation10], %s505_s13, %s505_s13, %s506_s14  }
   0x9   :  { %s47_s21 = sshll.u32 %s591_s3, 4  ;;  %s508_s22 = smov [#allocation3]   ;;  %s48_s21 = int_to_ptr.hbm [resolvable:$true] %s47_s21 }
   0xa   :  { %s24_s23 = sshll.u32 %s508_s22, 4  ;;  %s509_s5 = smov [#allocation8]   ;;  %s25_s23 = int_to_ptr.vmem [resolvable:$true] %s24_s23 }
   0xb   :  { %27 = dma.hbm_to_vmem [thread:$0]  %s23_s19, 256, %s25_s23, [#allocation4]  }
   0xc   :  { %s49_s24 = sshll.u32 %s509_s5, 4  ;;  %s75_s27 = sshll.u32 %s594_s6, 4  ;;  %s50_s24 = int_to_ptr.vmem [resolvable:$true] %s49_s24  ;;  %s76_s27 = int_to_ptr.hbm [resolvable:$true] %s75_s27 }
   0xd   :  { %55 = dma.hbm_to_vmem [thread:$0]  %s48_s21, 2048, %s50_s24, [#allocation7], %s505_s13, %s505_s13, %s506_s14  }
   0xe   :  { %s510_s0 = smov [#allocation11]  }
   0xf   :  { %s77_s28 = sshll.u32 %s510_s0, 4  ;;  %s78_s28 = int_to_ptr.vmem [resolvable:$true] %s77_s28 }
  0x10   :  { %83 = dma.hbm_to_vmem [thread:$0]  %s76_s27, 4096, %s78_s28, [#allocation10], %s505_s13, %s505_s13, %s506_s14  }
  0x11   :  { %496 = dma.done.wait [#allocation4], 256  }
  0x12   :  { %497 = vsyncadd [#allocation4], 4294967040 }
  0x13   :  { %498 = dma.done.wait [#allocation7], 4096  }
  0x14   :  { %499 = vsyncadd [#allocation7], 4294963200 }
  0x15   :  { %500 = dma.done.wait [#allocation10], 6144  }
  0x16   :  { %501 = vsyncadd [#allocation10], 4294961152  ;;  %v126_v0 = vld [vmem:[#allocation6 + $0x78] sm:$0xff]  ;;  %v125_v1 = vld [vmem:[#allocation6 + $0x70] sm:$0xff]  ;;  %s325_s13 = sshll.u32 %s596_s8, 4  ;;  %s326_s13 = int_to_ptr.hbm [resolvable:$true] %s325_s13 }
  0x17   :  { %131 = vmatpush.msra.mxu0 %v126_v0  ;;  %v124_v2 = vld [vmem:[#allocation6 + $0x68] sm:$0xff]  ;;  %v123_v3 = vld [vmem:[#allocation6 + $0x60] sm:$0xff]  ;;  %v167_v4 = vld [vmem:[#allocation8 + $0x78] sm:$0xff] }
  0x18   :  { %v122_v5 = vld [vmem:[#allocation6 + $0x58] sm:$0xff]  ;;  %172 = vmatpush.msra.mxu1 %v167_v4  ;;  %v166_v6 = vld [vmem:[#allocation8 + $0x70] sm:$0xff]  ;;  %v165_v7 = vld [vmem:[#allocation8 + $0x68] sm:$0xff] }
  0x19   :  { %132 = vmatpush.msra.mxu0 %v125_v1  ;;  %v121_v8 = vld [vmem:[#allocation6 + $0x50] sm:$0xff]  ;;  %v164_v9 = vld [vmem:[#allocation8 + $0x60] sm:$0xff]  ;;  %v120_v10 = vld [vmem:[#allocation6 + $0x48] sm:$0xff] }
  0x1a   :  { %173 = vmatpush.msra.mxu1 %v166_v6  ;;  %v163_v11 = vld [vmem:[#allocation8 + $0x58] sm:$0xff]  ;;  %v119_v12 = vld [vmem:[#allocation6 + $0x40] sm:$0xff]  ;;  %v162_v13 = vld [vmem:[#allocation8 + $0x50] sm:$0xff] }
  0x1b   :  { %133 = vmatpush.msra.mxu0 %v124_v2  ;;  %v118_v14 = vld [vmem:[#allocation6 + $0x38] sm:$0xff]  ;;  %v161_v15 = vld [vmem:[#allocation8 + $0x48] sm:$0xff]  ;;  %v117_v16 = vld [vmem:[#allocation6 + $0x30] sm:$0xff] }
  0x1c   :  { %174 = vmatpush.msra.mxu1 %v165_v7  ;;  %v160_v17 = vld [vmem:[#allocation8 + $0x40] sm:$0xff]  ;;  %v116_v18 = vld [vmem:[#allocation6 + $0x28] sm:$0xff]  ;;  %v159_v19 = vld [vmem:[#allocation8 + $0x38] sm:$0xff] }
  0x1d   :  { %134 = vmatpush.msra.mxu0 %v123_v3  ;;  %v115_v20 = vld [vmem:[#allocation6 + $0x20] sm:$0xff]  ;;  %v158_v21 = vld [vmem:[#allocation8 + $0x30] sm:$0xff]  ;;  %v114_v22 = vld [vmem:[#allocation6 + $0x18] sm:$0xff] }
  0x1e   :  { %175 = vmatpush.msra.mxu1 %v164_v9  ;;  %v157_v23 = vld [vmem:[#allocation8 + $0x28] sm:$0xff]  ;;  %v113_v24 = vld [vmem:[#allocation6 + $0x10] sm:$0xff]  ;;  %v156_v25 = vld [vmem:[#allocation8 + $0x20] sm:$0xff] }
  0x1f   :  { %135 = vmatpush.msra.mxu0 %v122_v5  ;;  %v112_v26 = vld [vmem:[#allocation6 + $0x8] sm:$0xff]  ;;  %v155_v27 = vld [vmem:[#allocation8 + $0x18] sm:$0xff]  ;;  %v111_v28 = vld [vmem:[#allocation6] sm:$0xff] }
  0x20   :  { %176 = vmatpush.msra.mxu1 %v163_v11  ;;  %v572_v29 = vld [vmem:[#allocation3] sm:$0xff]  ;;  %v153_v31 = vld [vmem:[#allocation8 + $0x8] sm:$0xff]  ;;  %v152_v32 = vld [vmem:[#allocation8] sm:$0xff] }
  0x21   :  { %136 = vmatpush.msra.mxu0 %v121_v8  ;;  %v154_v30 = vld [vmem:[#allocation8 + $0x10] sm:$0xff]  ;;  %v231_v33 = vld [vmem:[#allocation11 + $0x78] sm:$0xff]  ;;  %v229_v37 = vld [vmem:[#allocation11 + $0x68] sm:$0xff] }
  0x22   :  { %177 = vmatpush.msra.mxu1 %v162_v13  ;;  %v247_v34 = vld [vmem:[#allocation11 + $0xf8] sm:$0xff]  ;;  %v230_v35 = vld [vmem:[#allocation11 + $0x70] sm:$0xff]  ;;  %248 = vmatpush.msra.mxu2 %v231_v33  ;;  %v245_v38 = vld [vmem:[#allocation11 + $0xe8] sm:$0xff] }
  0x23   :  { %137 = vmatpush.msra.mxu0 %v120_v10  ;;  %268 = vmatpush.msra.mxu3 %v247_v34  ;;  %v246_v36 = vld [vmem:[#allocation11 + $0xf0] sm:$0xff]  ;;  %v213_v39 = vld [vmem:[#allocation9 + $0x78] sm:$0xff]  ;;  %v228_v40 = vld [vmem:[#allocation11 + $0x60] sm:$0xff] }
  0x24   :  { %178 = vmatpush.msra.mxu1 %v161_v15  ;;  %249 = vmatpush.msra.mxu2 %v230_v35  ;;  %v244_v41 = vld [vmem:[#allocation11 + $0xe0] sm:$0xff]  ;;  %v212_v42 = vld [vmem:[#allocation9 + $0x70] sm:$0xff]  ;;  %v211_v43 = vld [vmem:[#allocation9 + $0x68] sm:$0xff] }
  0x25   :  { %138 = vmatpush.msra.mxu0 %v119_v12  ;;  %269 = vmatpush.msra.mxu3 %v246_v36  ;;  %v227_v44 = vld [vmem:[#allocation11 + $0x58] sm:$0xff]  ;;  %v210_v46 = vld [vmem:[#allocation9 + $0x60] sm:$0xff]  ;;  %v226_v47 = vld [vmem:[#allocation11 + $0x50] sm:$0xff] }
  0x26   :  { %179 = vmatpush.msra.mxu1 %v160_v17  ;;  %250 = vmatpush.msra.mxu2 %v229_v37  ;;  %v243_v45 = vld [vmem:[#allocation11 + $0xd8] sm:$0xff]  ;;  %v242_v48 = vld [vmem:[#allocation11 + $0xd0] sm:$0xff]  ;;  %v225_v50 = vld [vmem:[#allocation11 + $0x48] sm:$0xff] }
  0x27   :  { %139 = vmatpush.msra.mxu0 %v118_v14  ;;  %270 = vmatpush.msra.mxu3 %v245_v38  ;;  %v209_v49 = vld [vmem:[#allocation9 + $0x58] sm:$0xff]  ;;  %v241_v51 = vld [vmem:[#allocation11 + $0xc8] sm:$0xff]  ;;  %v208_v52 = vld [vmem:[#allocation9 + $0x50] sm:$0xff] }
  0x28   :  { %180 = vmatpush.msra.mxu1 %v159_v19  ;;  %251 = vmatpush.msra.mxu2 %v228_v40  ;;  %v224_v53 = vld [vmem:[#allocation11 + $0x40] sm:$0xff]  ;;  %v207_v55 = vld [vmem:[#allocation9 + $0x48] sm:$0xff]  ;;  %v223_v56 = vld [vmem:[#allocation11 + $0x38] sm:$0xff] }
  0x29   :  { %140 = vmatpush.msra.mxu0 %v117_v16  ;;  %271 = vmatpush.msra.mxu3 %v244_v41  ;;  %v240_v54 = vld [vmem:[#allocation11 + $0xc0] sm:$0xff]  ;;  %v239_v57 = vld [vmem:[#allocation11 + $0xb8] sm:$0xff]  ;;  %v222_v59 = vld [vmem:[#allocation11 + $0x30] sm:$0xff] }
  0x2a   :  { %181 = vmatpush.msra.mxu1 %v158_v21  ;;  %252 = vmatpush.msra.mxu2 %v227_v44  ;;  %v206_v58 = vld [vmem:[#allocation9 + $0x40] sm:$0xff]  ;;  %v238_v60 = vld [vmem:[#allocation11 + $0xb0] sm:$0xff]  ;;  %v221_v61 = vld [vmem:[#allocation11 + $0x28] sm:$0xff] }
  0x2b   :  { %141 = vmatpush.msra.mxu0 %v116_v18  ;;  %272 = vmatpush.msra.mxu3 %v243_v45  ;;  %v237_v62 = vld [vmem:[#allocation11 + $0xa8] sm:$0xff]  ;;  %v220_v63 = vld [vmem:[#allocation11 + $0x20] sm:$0xff]  ;;  %v345_v1 = vld [vmem:[%s590_s2] ss:$0 sm:$0xff] }
  0x2c   :  { %182 = vmatpush.msra.mxu1 %v157_v23  ;;  %253 = vmatpush.msra.mxu2 %v226_v47  ;;  %v236_v0 = vld [vmem:[#allocation11 + $0xa0] sm:$0xff]  ;;  %v219_v5 = vld [vmem:[#allocation11 + $0x18] sm:$0xff]  ;;  %v218_v8 = vld [vmem:[#allocation11 + $0x10] sm:$0xff] }
  0x2d   :  { %142 = vmatpush.msra.mxu0 %v115_v20  ;;  %273 = vmatpush.msra.mxu3 %v242_v48  ;;  %v235_v6 = vld [vmem:[#allocation11 + $0x98] sm:$0xff]  ;;  %v234_v9 = vld [vmem:[#allocation11 + $0x90] sm:$0xff]  ;;  %v217_v11 = vld [vmem:[#allocation11 + $0x8] sm:$0xff] }
  0x2e   :  { %183 = vmatpush.msra.mxu1 %v156_v25  ;;  %254 = vmatpush.msra.mxu2 %v225_v50  ;;  %v205_v7 = vld [vmem:[#allocation9 + $0x38] sm:$0xff]  ;;  %v204_v10 = vld [vmem:[#allocation9 + $0x30] sm:$0xff]  ;;  %v233_v12 = vld [vmem:[#allocation11 + $0x88] sm:$0xff] }
  0x2f   :  { %143 = vmatpush.msra.mxu0 %v114_v22  ;;  %274 = vmatpush.msra.mxu3 %v241_v51  ;;  %v203_v13 = vld [vmem:[#allocation9 + $0x28] sm:$0xff]  ;;  %v216_v14 = vld [vmem:[#allocation11] sm:$0xff]  ;;  %v215_v17 = vld [vmem:[#allocation3 + $0x8] sm:$0xff] }
  0x30   :  { %184 = vmatpush.msra.mxu1 %v155_v27  ;;  %255 = vmatpush.msra.mxu2 %v224_v53  ;;  %v232_v15 = vld [vmem:[#allocation11 + $0x80] sm:$0xff]  ;;  %v201_v18 = vld [vmem:[#allocation9 + $0x18] sm:$0xff]  ;;  %v200_v19 = vld [vmem:[#allocation9 + $0x10] sm:$0xff] }
  0x31   :  { %144 = vmatpush.msra.mxu0 %v113_v24  ;;  %275 = vmatpush.msra.mxu3 %v240_v54  ;;  %v202_v16 = vld [vmem:[#allocation9 + $0x20] sm:$0xff]  ;;  %v199_v20 = vld [vmem:[#allocation9 + $0x8] sm:$0xff]  ;;  %v346_v22 = vld [vmem:[%s592_s4] ss:$0 sm:$0xff]  ;;  %s511_s4 = smov [#allocation12]  }
  0x32   :  { %185 = vmatpush.msra.mxu1 %v154_v30  ;;  %256 = vmatpush.msra.mxu2 %v223_v56  ;;  %v198_v21 = vld [vmem:[#allocation9] sm:$0xff]  ;;  %s323_s10 = sshll.u32 %s511_s4, 4  ;;  %s324_s10 = int_to_ptr.vmem [resolvable:$true] %s323_s10 }
  0x33   :  { %145 = vmatpush.msra.mxu0 %v112_v26  ;;  %276 = vmatpush.msra.mxu3 %v239_v57 }
  0x34   :  { %186 = vmatpush.msra.mxu1 %v153_v31  ;;  %257 = vmatpush.msra.mxu2 %v222_v59 }
  0x35   :  { %146 = vmatpush.msra.mxu0 %v111_v28  ;;  %277 = vmatpush.msra.mxu3 %v238_v60 }
  0x36   :  { %147 = vmatmul.f32.vlgmr.msra.gmra.mxu0 %v572_v29  ;;  %187 = vmatpush.msra.mxu1 %v152_v32  ;;  %v347_v32 = vld [vmem:[%s595_s7] ss:$0 sm:$0xff] }
  0x37   :  { %288 = vmatpush.msrb.mxu0 %v213_v39  ;;  %258 = vmatpush.msra.mxu2 %v221_v61 }
  0x38   :  { %278 = vmatpush.msra.mxu3 %v237_v62 }
  0x39   :  { %289 = vmatpush.msrb.mxu0 %v212_v42  ;;  %259 = vmatpush.msra.mxu2 %v220_v63 }
  0x3a   :  { %279 = vmatpush.msra.mxu3 %v236_v0 }
  0x3b   :  { %290 = vmatpush.msrb.mxu0 %v211_v43  ;;  %260 = vmatpush.msra.mxu2 %v219_v5 }
  0x3c   :  { %280 = vmatpush.msra.mxu3 %v235_v6 }
  0x3d   :  { %291 = vmatpush.msrb.mxu0 %v210_v46  ;;  %261 = vmatpush.msra.mxu2 %v218_v8 }
  0x3e   :  { %281 = vmatpush.msra.mxu3 %v234_v9 }
  0x3f   :  { %292 = vmatpush.msrb.mxu0 %v209_v49  ;;  %262 = vmatpush.msra.mxu2 %v217_v11 }
  0x40   :  { %282 = vmatpush.msra.mxu3 %v233_v12 }
  0x41   :  { %293 = vmatpush.msrb.mxu0 %v208_v52  ;;  %263 = vmatpush.msra.mxu2 %v216_v14 }
  0x42   :  { %283 = vmatpush.msra.mxu3 %v232_v15  ;;  %264 = vmatmul.f32.vlgmr.msra.gmra.mxu2 %v572_v29 }
  0x43   :  { %294 = vmatpush.msrb.mxu0 %v207_v55  ;;  %284 = vmatmul.f32.vlgmr.msra.gmra.mxu3 %v215_v17 }
  0x45   :  { %295 = vmatpush.msrb.mxu0 %v206_v58 }
  0x47   :  { %296 = vmatpush.msrb.mxu0 %v205_v7 }
  0x49   :  { %297 = vmatpush.msrb.mxu0 %v204_v10 }
  0x4b   :  { %298 = vmatpush.msrb.mxu0 %v203_v13 }
  0x4d   :  { %299 = vmatpush.msrb.mxu0 %v202_v16 }
  0x4f   :  { %300 = vmatpush.msrb.mxu0 %v201_v18 }
  0x51   :  { %301 = vmatpush.msrb.mxu0 %v200_v19 }
  0x53   :  { %302 = vmatpush.msrb.mxu0 %v199_v20 }
  0x55   :  { %303 = vmatpush.msrb.mxu0 %v198_v21 }
  0xb3   :  { %v148_v2 = vpop.f32.mrf.mxu0 }
  0xb4   :  { %v149_v3 = vadd.f32 %v345_v1, %v148_v2 }
  0xb6   :  { %v151_v4 = vmax.f32 %v149_v3, 0.0 }
  0xb8   :  { %188 = vmatmul.f32.vlgmr.msra.gmra.mxu1 %v151_v4 }
  0xc5   :  { %v265_v29 = vpop.f32.mrf.mxu2 }
  0xc6   :  { %v285_v30 = vpop.f32.mrf.mxu3 }
  0xc7   :  { %v286_v31 = vadd.f32 %v285_v30, %v265_v29 }
 0x135   :  { %v189_v23 = vpop.f32.mrf.mxu1 }
 0x136   :  { %v190_v24 = vadd.f32 %v346_v22, %v189_v23 }
 0x138   :  { %v192_v25 = vmul.f32 0.5, %v190_v24 }
 0x13a   :  { %348 = vtanh.f32 %v192_v25 }
 0x140   :  { %v349_v26 = vpop.eup %348 }
 0x141   :  { %v194_v27 = vadd.f32 1.0, %v349_v26 }
 0x143   :  { %v195_v28 = vmul.f32 0.5, %v194_v27 }
 0x145   :  { %304 = vmatmul.f32.vlgmr.msrb.gmra.mxu0 %v195_v28 }
 0x1c2   :  { %v305_v33 = vpop.f32.mrf.mxu0 }
 0x1c3   :  { %v306_v34 = vadd.f32 %v305_v33, %v286_v31 }
 0x1c5   :  { %v312_v35 = vadd.f32 %v347_v32, %v306_v34 }
 0x1c7   :  { %v313_v36 = vmul.f32 0.5, %v312_v35 }
 0x1c9   :  { %350 = vtanh.f32 %v313_v36 }
 0x1cf   :  { %v351_v37 = vpop.eup %350 }
 0x1d0   :  { %v315_v38 = vadd.f32 1.0, %v351_v37 }
 0x1d2   :  { %v316_v39 = vmul.f32 0.5, %v315_v38 }
 0x1d4   :  { %317 = vst [vmem:[#allocation12] sm:$0xff] %v316_v39 }
 0x1d5   :  { %328 = dma.vmem_to_hbm [thread:$0]  %s324_s10, 128, %s326_s13, [#allocation5]  }
 0x1d6   :  { %502 = dma.done.wait [#allocation5], 128  }
 0x1d7   :  { %503 = vsyncadd [#allocation5], 4294967168 }
 0x1d8   :  { %333 = vsyncpa [#allocation4], 1 }
 0x1d9   :  { %334 = vsyncpa [#allocation7], 1 }
 0x1da   :  { %335 = vsyncpa [#allocation10], 1 }
 0x1db   :  { %336 = vsyncpa [#allocation5], 1 }

</bundles_post_ra>
